<compile_context>
chip_gen: v5e
topology: v5e:2x2
jax: 0.10.0
libtpu: 0.0.40
codegen_flags: <defaults>
</compile_context>

<pallas_src>
import functools

import jax
import jax.numpy as jnp
import numpy as np
from jax import lax
from jax.experimental import pallas as pl
from jax.experimental.pallas import tpu as pltpu

NEG_SLOPE = 0.2      # PyG GATConv default LeakyReLU slope
MASK_VAL = -1e30


# ----------------------------------------------------------------------------- kernel
def _gatnet_kernel(x_ref, adj_ref,
                   w1_ref, adst1_ref, asrc1_ref, b1_ref,
                   w2_ref, adst2_ref, asrc2_ref, b2_ref,
                   pool_ref, wfc_ref, bfc_ref,
                   o_ref,
                   h1_ref, h2_ref,
                   *, heads1, hidden):
    # Additive -inf mask, computed once and shared by both layers (hoisted out of
    # every head loop: saves N^2 compares + broadcasts per extra head / layer).
    mask_add = jnp.where(adj_ref[...] > 0.0, 0.0, MASK_VAL)                 # (N, N)

    def gat_layer(x, w_ref, adst_ref, asrc_ref, b_ref, h_ref, heads, apply_relu):
        # Projection for all heads at once: one lane-dense MXU matmul.
        hh = jnp.dot(x, w_ref[...], preferred_element_type=jnp.float32)     # (N, heads*hidden)
        # Batched attention projections via block-diagonal attention matrices.
        e_dst = jnp.dot(hh, adst_ref[...],
                        preferred_element_type=jnp.float32)                 # (N, heads)
        e_src = lax.dot_general(asrc_ref[...], hh, (((1,), (1,)), ((), ())),
                                preferred_element_type=jnp.float32)         # (heads, N)
        for hd in range(heads):                      # heads is a static Python int
            lo, hi = hd * hidden, (hd + 1) * hidden
            z = e_dst[:, hd:hd + 1] + e_src[hd:hd + 1, :]   # (N, N): logit edge j -> i
            z = jnp.where(z > 0, z, NEG_SLOPE * z)          # LeakyReLU
            z = z + mask_add                                # mask non-edges
            m = jnp.max(z, axis=-1, keepdims=True)          # softmax over sources j
            p = jnp.exp(z - m)
            inv = pl.reciprocal(jnp.sum(p, axis=-1, keepdims=True), approx=True)
            # Normalize the (N, f_out) aggregate (not the (N, N) alpha matrix) and
            # write straight into the lane slice of the VMEM accumulator (no concat).
            h_ref[:, lo:hi] = jnp.dot(p, hh[:, lo:hi],
                                      preferred_element_type=jnp.float32) * inv
        out = h_ref[...] + b_ref[...]                       # bias once, full-width
        if apply_relu:
            out = jnp.maximum(out, 0.0)
        return out

    h1 = gat_layer(x_ref[...], w1_ref, adst1_ref, asrc1_ref, b1_ref, h1_ref,
                   heads1, apply_relu=True)
    h2 = gat_layer(h1, w2_ref, adst2_ref, asrc2_ref, b2_ref, h2_ref,
                   1, apply_relu=False)

    # global_mean_pool (pool_mat @ h2) fused with the final Linear.
    pooled = jnp.dot(pool_ref[...], h2, preferred_element_type=jnp.float32)  # (B, hidden)
    o_ref[...] = jnp.dot(pooled, wfc_ref[...],
                         preferred_element_type=jnp.float32) + bfc_ref[...]


# ----------------------------------------------------------------------------- wrappers
def _vmem_spec():
    return pl.BlockSpec(memory_space=pltpu.MemorySpace.VMEM)


def _block_diag_attn(a_src, a_dst):
    """Host-side glue: build block-diagonal attention matrices so per-head <h, a>
    projections become two small MXU ops per layer inside the kernel."""
    heads, f_out = a_src.shape
    eye = jnp.eye(heads, dtype=a_src.dtype)
    # a_dst_mat[h*f_out + k, g] = a_dst[h, k] * (h == g)  ->  hh @ a_dst_mat = (N, heads)
    a_dst_mat = (a_dst[:, :, None] * eye[:, None, :]).reshape(heads * f_out, heads)
    # a_src_mat[h, g*f_out + k] = a_src[h, k] * (h == g)  ->  contract with hh over lanes
    a_src_mat = (a_src[:, None, :] * eye[:, :, None]).reshape(heads, heads * f_out)
    return a_src_mat, a_dst_mat


def gat_net_forward(params, x, adj, pool_mat, *, heads=2):
    n, fin = x.shape
    hidden = params["hidden"]
    b, out_dim = pool_mat.shape[0], params["w_fc"].shape[1]
    hf1 = heads * hidden

    asrc1, adst1 = _block_diag_attn(params["a_src1"], params["a_dst1"])
    asrc2, adst2 = _block_diag_attn(params["a_src2"], params["a_dst2"])

    kernel = functools.partial(_gatnet_kernel, heads1=heads, hidden=hidden)

    flops = (2 * n * fin * hf1 + 4 * n * hf1 * heads                   # conv1 proj + attn proj
             + heads * (2 * n * n * hidden + 8 * n * n)                # conv1 softmax + agg
             + 2 * n * hf1 * hidden + 4 * n * hidden                   # conv2 proj + attn proj
             + 2 * n * n * hidden + 8 * n * n                          # conv2 softmax + agg
             + 2 * b * n * hidden + 2 * b * hidden * out_dim)          # pool + fc
    transcendentals = (heads + 1) * n * (n + 1)                        # exp + reciprocals
    bytes_accessed = 4 * (x.size + adj.size + pool_mat.size
                          + params["w1"].size + params["w2"].size + params["w_fc"].size
                          + asrc1.size + adst1.size + asrc2.size + adst2.size
                          + params["b1"].size + params["b2"].size + params["b_fc"].size
                          + b * out_dim)

    return pl.pallas_call(
        kernel,
        out_shape=jax.ShapeDtypeStruct((b, out_dim), jnp.float32),
        in_specs=[_vmem_spec()] * 13,
        out_specs=_vmem_spec(),
        scratch_shapes=[pltpu.VMEM((n, heads * hidden), jnp.float32),   # h1 accumulator
                        pltpu.VMEM((n, hidden), jnp.float32)],          # h2 accumulator
        cost_estimate=pl.CostEstimate(flops=flops,
                                      transcendentals=transcendentals,
                                      bytes_accessed=bytes_accessed),
    )(x, adj, params["w1"], adst1, asrc1, params["b1"],
      params["w2"], adst2, asrc2, params["b2"],
      pool_mat, params["w_fc"], params["b_fc"])


# ----------------------------------------------------------------------------- reference (plain JAX)
def _gat_layer_ref(x, w, a_src, a_dst, b, adj, heads, f_out, apply_relu):
    outs = []
    for hd in range(heads):
        lo, hi = hd * f_out, (hd + 1) * f_out
        hh = x @ w[:, lo:hi]
        e_dst = jnp.sum(hh * a_dst[hd:hd + 1, :], axis=-1, keepdims=True)
        e_src = jnp.sum(hh * a_src[hd:hd + 1, :], axis=-1, keepdims=True).T
        z = e_dst + e_src
        z = jnp.where(z > 0, z, NEG_SLOPE * z)
        z = jnp.where(adj > 0, z, MASK_VAL)
        z = z - jnp.max(z, axis=-1, keepdims=True)
        p = jnp.exp(z)
        alpha = p / jnp.sum(p, axis=-1, keepdims=True)
        outs.append(alpha @ hh + b[:, lo:hi])
    out = outs[0] if heads == 1 else jnp.concatenate(outs, axis=-1)
    return jnp.maximum(out, 0.0) if apply_relu else out


def gat_net_ref(params, x, adj, pool_mat):
    h1 = _gat_layer_ref(x, params["w1"], params["a_src1"], params["a_dst1"],
                        params["b1"], adj, 2, params["hidden"], True)
    h2 = _gat_layer_ref(h1, params["w2"], params["a_src2"], params["a_dst2"],
                        params["b2"], adj, 1, params["hidden"], False)
    return (pool_mat @ h2) @ params["w_fc"] + params["b_fc"]


# ----------------------------------------------------------------------------- main
if __name__ == "__main__":
    # Model dims (from the PyTorch module): hidden_dim=64, output_dim=2, heads=2.
    N, INPUT_DIM, HIDDEN, HEADS, OUT_DIM = 32, 16, 64, 2, 2
    NUM_GRAPHS, NUM_EDGES = 4, 64

    key = jax.random.PRNGKey(0)
    keys = jax.random.split(key, 12)

    def glorot(k, shape):
        fan_in = shape[0] if len(shape) > 1 else shape[-1]
        return jax.random.normal(k, shape, jnp.float32) / np.sqrt(fan_in)

    params = {
        "hidden": HIDDEN,
        # conv1: in=INPUT_DIM, out=HIDDEN, heads=2, concat=True
        "w1": glorot(keys[0], (INPUT_DIM, HEADS * HIDDEN)),
        "a_src1": glorot(keys[1], (HEADS, HIDDEN)),
        "a_dst1": glorot(keys[2], (HEADS, HIDDEN)),
        "b1": jnp.zeros((1, HEADS * HIDDEN), jnp.float32),
        # conv2: in=HIDDEN*HEADS, out=HIDDEN, heads=1
        "w2": glorot(keys[3], (HEADS * HIDDEN, HIDDEN)),
        "a_src2": glorot(keys[4], (1, HIDDEN)),
        "a_dst2": glorot(keys[5], (1, HIDDEN)),
        "b2": jnp.zeros((1, HIDDEN), jnp.float32),
        # fc: HIDDEN -> OUT_DIM
        "w_fc": glorot(keys[6], (HIDDEN, OUT_DIM)),
        "b_fc": glorot(keys[7], (1, OUT_DIM)) * 0.1,
    }

    # Synthetic graph data (PyG-style): x, edge_index, batch.
    x = jax.random.normal(keys[8], (N, INPUT_DIM), jnp.float32)
    src = jax.random.randint(keys[9], (NUM_EDGES,), 0, N)
    dst = jax.random.randint(keys[10], (NUM_EDGES,), 0, N)
    # Dense adjacency (adj[dst, src] = 1) + self loops, matching add_self_loops=True.
    adj = jnp.zeros((N, N), jnp.float32).at[dst, src].set(1.0)
    adj = jnp.maximum(adj, jnp.eye(N, dtype=jnp.float32))
    # batch assignment: NUM_GRAPHS graphs of equal size -> mean-pool matrix [B, N].
    batch = jnp.repeat(jnp.arange(NUM_GRAPHS), N // NUM_GRAPHS)
    onehot = (batch[None, :] == jnp.arange(NUM_GRAPHS)[:, None]).astype(jnp.float32)
    pool_mat = onehot / jnp.sum(onehot, axis=1, keepdims=True)

    out = jax.block_until_ready(gat_net_forward(params, x, adj, pool_mat, heads=HEADS))
    ref = jax.block_until_ready(gat_net_ref(params, x, adj, pool_mat))

    assert out.shape == (NUM_GRAPHS, OUT_DIM), out.shape
    # Slightly loosened tolerance accounts for the EUP approx-reciprocal softmax norm.
    np.testing.assert_allclose(np.asarray(out), np.asarray(ref), rtol=5e-3, atol=5e-3)
    print("KERNEL_OK")
</pallas_src>

<mosaic_0001>
module attributes {stable_mosaic.version = 11 : i64} {
  func.func @_gatnet_kernel(%arg0: memref<32x16xf32, #tpu.memory_space<vmem>>, %arg1: memref<32x32xf32, #tpu.memory_space<vmem>>, %arg2: memref<16x128xf32, #tpu.memory_space<vmem>>, %arg3: memref<128x2xf32, #tpu.memory_space<vmem>>, %arg4: memref<2x128xf32, #tpu.memory_space<vmem>>, %arg5: memref<1x128xf32, #tpu.memory_space<vmem>>, %arg6: memref<128x64xf32, #tpu.memory_space<vmem>>, %arg7: memref<64x1xf32, #tpu.memory_space<vmem>>, %arg8: memref<1x64xf32, #tpu.memory_space<vmem>>, %arg9: memref<1x64xf32, #tpu.memory_space<vmem>>, %arg10: memref<4x32xf32, #tpu.memory_space<vmem>>, %arg11: memref<64x2xf32, #tpu.memory_space<vmem>>, %arg12: memref<1x2xf32, #tpu.memory_space<vmem>>, %arg13: memref<4x2xf32, #tpu.memory_space<vmem>>, %arg14: memref<32x128xf32, #tpu.memory_space<vmem>>, %arg15: memref<32x64xf32, #tpu.memory_space<vmem>>) attributes {dimension_semantics = [], scalar_prefetch = 0 : i64, scratch_operands = 2 : i64, tpu.core_type = #tpu.core_type<tc>} {
    %c0 = arith.constant 0 : index
    %c0_0 = arith.constant 0 : index
    %0 = vector.load %arg1[%c0, %c0_0] : memref<32x32xf32, #tpu.memory_space<vmem>>, vector<32x32xf32>
    %cst = arith.constant 0.000000e+00 : f32
    %1 = vector.broadcast %cst : f32 to vector<32x32xf32>
    %2 = arith.cmpf ogt, %0, %1 : vector<32x32xf32>
    %cst_1 = arith.constant 0.000000e+00 : f32
    %cst_2 = arith.constant -1.000000e+30 : f32
    %3 = vector.broadcast %cst_1 : f32 to vector<32x32xf32>
    %4 = vector.broadcast %cst_2 : f32 to vector<32x32xf32>
    %5 = arith.select %2, %3, %4 : vector<32x32xi1>, vector<32x32xf32>
    %c0_3 = arith.constant 0 : index
    %c0_4 = arith.constant 0 : index
    %6 = vector.load %arg0[%c0_3, %c0_4] : memref<32x16xf32, #tpu.memory_space<vmem>>, vector<32x16xf32>
    %c0_5 = arith.constant 0 : index
    %c0_6 = arith.constant 0 : index
    %7 = vector.load %arg2[%c0_5, %c0_6] : memref<16x128xf32, #tpu.memory_space<vmem>>, vector<16x128xf32>
    %cst_7 = arith.constant dense<0.000000e+00> : vector<32x128xf32>
    %8 = tpu.matmul %6, %7, %cst_7 {dimension_numbers = #tpu.dot_dimension_numbers<[1], [0], [0], [1], [0, 0, 1, 1], [], []>} : vector<32x16xf32>, vector<16x128xf32>, vector<32x128xf32> -> vector<32x128xf32>
    %c0_8 = arith.constant 0 : index
    %c0_9 = arith.constant 0 : index
    %9 = vector.load %arg3[%c0_8, %c0_9] : memref<128x2xf32, #tpu.memory_space<vmem>>, vector<128x2xf32>
    %cst_10 = arith.constant dense<0.000000e+00> : vector<32x2xf32>
    %10 = tpu.matmul %8, %9, %cst_10 {dimension_numbers = #tpu.dot_dimension_numbers<[1], [0], [0], [1], [0, 0, 1, 1], [], []>} : vector<32x128xf32>, vector<128x2xf32>, vector<32x2xf32> -> vector<32x2xf32>
    %c0_11 = arith.constant 0 : index
    %c0_12 = arith.constant 0 : index
    %11 = vector.load %arg4[%c0_11, %c0_12] : memref<2x128xf32, #tpu.memory_space<vmem>>, vector<2x128xf32>
    %cst_13 = arith.constant dense<0.000000e+00> : vector<2x32xf32>
    %12 = tpu.matmul %11, %8, %cst_13 {dimension_numbers = #tpu.dot_dimension_numbers<[1], [1], [0], [0], [0, 0, 1, 0], [], []>} : vector<2x128xf32>, vector<32x128xf32>, vector<2x32xf32> -> vector<2x32xf32>
    %13 = vector.extract_strided_slice %10 {offsets = [0, 0], sizes = [32, 1], strides = [1, 1]} : vector<32x2xf32> to vector<32x1xf32>
    %14 = vector.extract_strided_slice %12 {offsets = [0, 0], sizes = [1, 32], strides = [1, 1]} : vector<2x32xf32> to vector<1x32xf32>
    %15 = vector.broadcast %13 : vector<32x1xf32> to vector<32x32xf32>
    %16 = vector.broadcast %14 : vector<1x32xf32> to vector<32x32xf32>
    %17 = arith.addf %15, %16 : vector<32x32xf32>
    %cst_14 = arith.constant 0.000000e+00 : f32
    %18 = vector.broadcast %cst_14 : f32 to vector<32x32xf32>
    %19 = arith.cmpf ogt, %17, %18 : vector<32x32xf32>
    %cst_15 = arith.constant 2.000000e-01 : f32
    %20 = vector.broadcast %cst_15 : f32 to vector<32x32xf32>
    %21 = arith.mulf %20, %17 : vector<32x32xf32>
    %22 = arith.select %19, %17, %21 : vector<32x32xi1>, vector<32x32xf32>
    %23 = arith.addf %22, %5 : vector<32x32xf32>
    %cst_16 = arith.constant dense<0xFF800000> : vector<32xf32>
    %24 = vector.multi_reduction <maximumf>, %23, %cst_16 [1] : vector<32x32xf32> to vector<32xf32>
    %25 = vector.shape_cast %24 : vector<32xf32> to vector<32x1xf32>
    %26 = vector.broadcast %25 : vector<32x1xf32> to vector<32x32xf32>
    %27 = arith.subf %23, %26 : vector<32x32xf32>
    %28 = math.exp %27 : vector<32x32xf32>
    %cst_17 = arith.constant dense<0.000000e+00> : vector<32xf32>
    %29 = vector.multi_reduction <add>, %28, %cst_17 [1] : vector<32x32xf32> to vector<32xf32>
    %30 = vector.shape_cast %29 : vector<32xf32> to vector<32x1xf32>
    %31 = tpu.reciprocal %30 {approx = true} : vector<32x1xf32> -> vector<32x1xf32>
    %32 = vector.extract_strided_slice %8 {offsets = [0, 0], sizes = [32, 64], strides = [1, 1]} : vector<32x128xf32> to vector<32x64xf32>
    %cst_18 = arith.constant dense<0.000000e+00> : vector<32x64xf32>
    %33 = tpu.matmul %28, %32, %cst_18 {dimension_numbers = #tpu.dot_dimension_numbers<[1], [0], [0], [1], [0, 0, 1, 1], [], []>} : vector<32x32xf32>, vector<32x64xf32>, vector<32x64xf32> -> vector<32x64xf32>
    %34 = vector.broadcast %31 : vector<32x1xf32> to vector<32x64xf32>
    %35 = arith.mulf %33, %34 : vector<32x64xf32>
    %c0_19 = arith.constant 0 : index
    %c0_20 = arith.constant 0 : index
    %36 = vector.load %arg14[%c0_19, %c0_20] : memref<32x128xf32, #tpu.memory_space<vmem>>, vector<32x64xf32>
    tpu.vector_store %arg14[%c0_19, %c0_20], %35 {strides = array<i32>} : memref<32x128xf32, #tpu.memory_space<vmem>>, vector<32x64xf32>,
    %37 = vector.extract_strided_slice %10 {offsets = [0, 1], sizes = [32, 1], strides = [1, 1]} : vector<32x2xf32> to vector<32x1xf32>
    %38 = vector.extract_strided_slice %12 {offsets = [1, 0], sizes = [1, 32], strides = [1, 1]} : vector<2x32xf32> to vector<1x32xf32>
    %39 = vector.broadcast %37 : vector<32x1xf32> to vector<32x32xf32>
    %40 = vector.broadcast %38 : vector<1x32xf32> to vector<32x32xf32>
    %41 = arith.addf %39, %40 : vector<32x32xf32>
    %cst_21 = arith.constant 0.000000e+00 : f32
    %42 = vector.broadcast %cst_21 : f32 to vector<32x32xf32>
    %43 = arith.cmpf ogt, %41, %42 : vector<32x32xf32>
    %cst_22 = arith.constant 2.000000e-01 : f32
    %44 = vector.broadcast %cst_22 : f32 to vector<32x32xf32>
    %45 = arith.mulf %44, %41 : vector<32x32xf32>
    %46 = arith.select %43, %41, %45 : vector<32x32xi1>, vector<32x32xf32>
    %47 = arith.addf %46, %5 : vector<32x32xf32>
    %cst_23 = arith.constant dense<0xFF800000> : vector<32xf32>
    %48 = vector.multi_reduction <maximumf>, %47, %cst_23 [1] : vector<32x32xf32> to vector<32xf32>
    %49 = vector.shape_cast %48 : vector<32xf32> to vector<32x1xf32>
    %50 = vector.broadcast %49 : vector<32x1xf32> to vector<32x32xf32>
    %51 = arith.subf %47, %50 : vector<32x32xf32>
    %52 = math.exp %51 : vector<32x32xf32>
    %cst_24 = arith.constant dense<0.000000e+00> : vector<32xf32>
    %53 = vector.multi_reduction <add>, %52, %cst_24 [1] : vector<32x32xf32> to vector<32xf32>
    %54 = vector.shape_cast %53 : vector<32xf32> to vector<32x1xf32>
    %55 = tpu.reciprocal %54 {approx = true} : vector<32x1xf32> -> vector<32x1xf32>
    %56 = vector.extract_strided_slice %8 {offsets = [0, 64], sizes = [32, 64], strides = [1, 1]} : vector<32x128xf32> to vector<32x64xf32>
    %cst_25 = arith.constant dense<0.000000e+00> : vector<32x64xf32>
    %57 = tpu.matmul %52, %56, %cst_25 {dimension_numbers = #tpu.dot_dimension_numbers<[1], [0], [0], [1], [0, 0, 1, 1], [], []>} : vector<32x32xf32>, vector<32x64xf32>, vector<32x64xf32> -> vector<32x64xf32>
    %58 = vector.broadcast %55 : vector<32x1xf32> to vector<32x64xf32>
    %59 = arith.mulf %57, %58 : vector<32x64xf32>
    %c0_26 = arith.constant 0 : index
    %c64 = arith.constant 64 : index
    %60 = vector.load %arg14[%c0_26, %c64] : memref<32x128xf32, #tpu.memory_space<vmem>>, vector<32x64xf32>
    tpu.vector_store %arg14[%c0_26, %c64], %59 {strides = array<i32>} : memref<32x128xf32, #tpu.memory_space<vmem>>, vector<32x64xf32>,
    %c0_27 = arith.constant 0 : index
    %c0_28 = arith.constant 0 : index
    %61 = vector.load %arg14[%c0_27, %c0_28] : memref<32x128xf32, #tpu.memory_space<vmem>>, vector<32x128xf32>
    %c0_29 = arith.constant 0 : index
    %c0_30 = arith.constant 0 : index
    %62 = vector.load %arg5[%c0_29, %c0_30] : memref<1x128xf32, #tpu.memory_space<vmem>>, vector<1x128xf32>
    %63 = vector.broadcast %62 : vector<1x128xf32> to vector<32x128xf32>
    %64 = arith.addf %61, %63 : vector<32x128xf32>
    %cst_31 = arith.constant 0.000000e+00 : f32
    %65 = vector.broadcast %cst_31 : f32 to vector<32x128xf32>
    %66 = arith.maximumf %64, %65 : vector<32x128xf32>
    %c0_32 = arith.constant 0 : index
    %c0_33 = arith.constant 0 : index
    %67 = vector.load %arg6[%c0_32, %c0_33] : memref<128x64xf32, #tpu.memory_space<vmem>>, vector<128x64xf32>
    %cst_34 = arith.constant dense<0.000000e+00> : vector<32x64xf32>
    %68 = tpu.matmul %66, %67, %cst_34 {dimension_numbers = #tpu.dot_dimension_numbers<[1], [0], [0], [1], [0, 0, 1, 1], [], []>} : vector<32x128xf32>, vector<128x64xf32>, vector<32x64xf32> -> vector<32x64xf32>
    %c0_35 = arith.constant 0 : index
    %c0_36 = arith.constant 0 : index
    %69 = vector.load %arg7[%c0_35, %c0_36] : memref<64x1xf32, #tpu.memory_space<vmem>>, vector<64x1xf32>
    %cst_37 = arith.constant dense<0.000000e+00> : vector<32x1xf32>
    %70 = tpu.matmul %68, %69, %cst_37 {dimension_numbers = #tpu.dot_dimension_numbers<[1], [0], [0], [1], [0, 0, 1, 1], [], []>} : vector<32x64xf32>, vector<64x1xf32>, vector<32x1xf32> -> vector<32x1xf32>
    %c0_38 = arith.constant 0 : index
    %c0_39 = arith.constant 0 : index
    %71 = vector.load %arg8[%c0_38, %c0_39] : memref<1x64xf32, #tpu.memory_space<vmem>>, vector<1x64xf32>
    %cst_40 = arith.constant dense<0.000000e+00> : vector<1x32xf32>
    %72 = tpu.matmul %71, %68, %cst_40 {dimension_numbers = #tpu.dot_dimension_numbers<[1], [1], [0], [0], [0, 0, 1, 0], [], []>} : vector<1x64xf32>, vector<32x64xf32>, vector<1x32xf32> -> vector<1x32xf32>
    %73 = vector.broadcast %70 : vector<32x1xf32> to vector<32x32xf32>
    %74 = vector.broadcast %72 : vector<1x32xf32> to vector<32x32xf32>
    %75 = arith.addf %73, %74 : vector<32x32xf32>
    %cst_41 = arith.constant 0.000000e+00 : f32
    %76 = vector.broadcast %cst_41 : f32 to vector<32x32xf32>
    %77 = arith.cmpf ogt, %75, %76 : vector<32x32xf32>
    %cst_42 = arith.constant 2.000000e-01 : f32
    %78 = vector.broadcast %cst_42 : f32 to vector<32x32xf32>
    %79 = arith.mulf %78, %75 : vector<32x32xf32>
    %80 = arith.select %77, %75, %79 : vector<32x32xi1>, vector<32x32xf32>
    %81 = arith.addf %80, %5 : vector<32x32xf32>
    %cst_43 = arith.constant dense<0xFF800000> : vector<32xf32>
    %82 = vector.multi_reduction <maximumf>, %81, %cst_43 [1] : vector<32x32xf32> to vector<32xf32>
    %83 = vector.shape_cast %82 : vector<32xf32> to vector<32x1xf32>
    %84 = vector.broadcast %83 : vector<32x1xf32> to vector<32x32xf32>
    %85 = arith.subf %81, %84 : vector<32x32xf32>
    %86 = math.exp %85 : vector<32x32xf32>
    %cst_44 = arith.constant dense<0.000000e+00> : vector<32xf32>
    %87 = vector.multi_reduction <add>, %86, %cst_44 [1] : vector<32x32xf32> to vector<32xf32>
    %88 = vector.shape_cast %87 : vector<32xf32> to vector<32x1xf32>
    %89 = tpu.reciprocal %88 {approx = true} : vector<32x1xf32> -> vector<32x1xf32>
    %cst_45 = arith.constant dense<0.000000e+00> : vector<32x64xf32>
    %90 = tpu.matmul %86, %68, %cst_45 {dimension_numbers = #tpu.dot_dimension_numbers<[1], [0], [0], [1], [0, 0, 1, 1], [], []>} : vector<32x32xf32>, vector<32x64xf32>, vector<32x64xf32> -> vector<32x64xf32>
    %91 = vector.broadcast %89 : vector<32x1xf32> to vector<32x64xf32>
    %92 = arith.mulf %90, %91 : vector<32x64xf32>
    %c0_46 = arith.constant 0 : index
    %c0_47 = arith.constant 0 : index
    %93 = vector.load %arg15[%c0_46, %c0_47] : memref<32x64xf32, #tpu.memory_space<vmem>>, vector<32x64xf32>
    tpu.vector_store %arg15[%c0_46, %c0_47], %92 {strides = array<i32>} : memref<32x64xf32, #tpu.memory_space<vmem>>, vector<32x64xf32>,
    %c0_48 = arith.constant 0 : index
    %c0_49 = arith.constant 0 : index
    %94 = vector.load %arg15[%c0_48, %c0_49] : memref<32x64xf32, #tpu.memory_space<vmem>>, vector<32x64xf32>
    %c0_50 = arith.constant 0 : index
    %c0_51 = arith.constant 0 : index
    %95 = vector.load %arg9[%c0_50, %c0_51] : memref<1x64xf32, #tpu.memory_space<vmem>>, vector<1x64xf32>
    %96 = vector.broadcast %95 : vector<1x64xf32> to vector<32x64xf32>
    %97 = arith.addf %94, %96 : vector<32x64xf32>
    %c0_52 = arith.constant 0 : index
    %c0_53 = arith.constant 0 : index
    %98 = vector.load %arg10[%c0_52, %c0_53] : memref<4x32xf32, #tpu.memory_space<vmem>>, vector<4x32xf32>
    %cst_54 = arith.constant dense<0.000000e+00> : vector<4x64xf32>
    %99 = tpu.matmul %98, %97, %cst_54 {dimension_numbers = #tpu.dot_dimension_numbers<[1], [0], [0], [1], [0, 0, 1, 1], [], []>} : vector<4x32xf32>, vector<32x64xf32>, vector<4x64xf32> -> vector<4x64xf32>
    %c0_55 = arith.constant 0 : index
    %c0_56 = arith.constant 0 : index
    %100 = vector.load %arg11[%c0_55, %c0_56] : memref<64x2xf32, #tpu.memory_space<vmem>>, vector<64x2xf32>
    %cst_57 = arith.constant dense<0.000000e+00> : vector<4x2xf32>
    %101 = tpu.matmul %99, %100, %cst_57 {dimension_numbers = #tpu.dot_dimension_numbers<[1], [0], [0], [1], [0, 0, 1, 1], [], []>} : vector<4x64xf32>, vector<64x2xf32>, vector<4x2xf32> -> vector<4x2xf32>
    %c0_58 = arith.constant 0 : index
    %c0_59 = arith.constant 0 : index
    %102 = vector.load %arg12[%c0_58, %c0_59] : memref<1x2xf32, #tpu.memory_space<vmem>>, vector<1x2xf32>
    %103 = vector.broadcast %102 : vector<1x2xf32> to vector<4x2xf32>
    %104 = arith.addf %101, %103 : vector<4x2xf32>
    %c0_60 = arith.constant 0 : index
    %c0_61 = arith.constant 0 : index
    %105 = vector.load %arg13[%c0_60, %c0_61] : memref<4x2xf32, #tpu.memory_space<vmem>>, vector<4x2xf32>
    tpu.vector_store %arg13[%c0_60, %c0_61], %104 {strides = array<i32>} : memref<4x2xf32, #tpu.memory_space<vmem>>, vector<4x2xf32>,
    return
  }
}

</mosaic_0001>

<bundles_post_ra>
// kernel: tpu_custom_call.1
= control target key start
LH: loop header
LB: loop body
LE: loop exit
PB: predicated region body
PF: predicated region fallthrough
CT: control target
= control target key end

     0   :  { %vm62_vm0 = vcmask 130048   ;;  %v903_v24 = vmov 1   ;;  %v904_v26 = vmov 0   ;;  %s905_s16 = smov 64   ;;  %v906_v45 = vmov -1e+30   ;;  %s1284_s2 = inlined_call_operand.vmem [shape: f32[16,128], index: 2, kind: input, shape index: {}]   ;;  %s1285_s0 = inlined_call_operand.vmem [shape: f32[32,16], index: 0, kind: input, shape index: {}]   ;;  %s1286_s3 = inlined_call_operand.vmem [shape: f32[128,2], index: 3, kind: input, shape index: {}]   ;;  %s1287_s4 = inlined_call_operand.vmem [shape: f32[2,128], index: 4, kind: input, shape index: {}]   ;;  %s1288_s1 = inlined_call_operand.vmem [shape: f32[32,32], index: 1, kind: input, shape index: {}]   ;;  %s1289_s5 = inlined_call_operand.vmem [shape: f32[1,128], index: 5, kind: input, shape index: {}]   ;;  %s1290_s6 = inlined_call_operand.vmem [shape: f32[128,64], index: 6, kind: input, shape index: {}]   ;;  %s1291_s7 = inlined_call_operand.vmem [shape: f32[64,1], index: 7, kind: input, shape index: {}]   ;;  %s1292_s8 = inlined_call_operand.vmem [shape: f32[1,64], index: 8, kind: input, shape index: {}]   ;;  %s1293_s9 = inlined_call_operand.vmem [shape: f32[1,64], index: 9, kind: input, shape index: {}]   ;;  %s1294_s11 = inlined_call_operand.vmem [shape: f32[64,2], index: 11, kind: input, shape index: {}]   ;;  %s1295_s10 = inlined_call_operand.vmem [shape: f32[4,32], index: 10, kind: input, shape index: {}]   ;;  %s1296_s12 = inlined_call_operand.vmem [shape: f32[1,2], index: 12, kind: input, shape index: {}]   ;;  %s1297_s13 = inlined_call_operand.vmem [shape: f32[4,2], index: 13, kind: output, shape index: {}]  }
   0x1   :  { %v61_v0 = vld [vmem:[%s1284_s2 + $0x8] sm:$0xff]  ;;  %v60_v1 = vld [vmem:[%s1284_s2] sm:$0xff]  ;;  %v119_v3 = vld [vmem:[%s1286_s3 + $0x78] sm:$0xff]  ;;  %837 = vset.pattern.permute.xlu0 %v903_v24  ;;  %838 = vset.pattern.permute.xlu2 %v904_v26  ;;  %vm211_vm3 = vcmask 261120   ;;  %vm297_vm14 = vcmask 523264   ;;  %vm456_vm15 = vcmask 1048064  }
   0x2   :  { %89 = vmatpush.msra.mxu0 %v61_v0  ;;  %v56_v2 = vld [vmem:[%s1285_s0] sm:$0xff]  ;;  %v118_v4 = vld [vmem:[%s1286_s3 + $0x70] sm:$0xff]  ;;  %120 = vmatpush.msra.mxu1 %v119_v3  ;;  %v117_v5 = vld [vmem:[%s1286_s3 + $0x68] sm:$0xff] }
   0x3   :  { %v116_v6 = vld [vmem:[%s1286_s3 + $0x60] sm:$0xff]  ;;  %v115_v7 = vld [vmem:[%s1286_s3 + $0x58] sm:$0xff]  ;;  %v57_v8 = vld [vmem:[%s1285_s0 + $0x8] sm:$0xff]  ;;  %839 = vset.pattern.permute.xlu1 %v903_v24 }
   0x4   :  { %90 = vmatpush.msra.mxu0 %v60_v1  ;;  %121 = vmatpush.msra.mxu1 %v118_v4  ;;  %v114_v9 = vld [vmem:[%s1286_s3 + $0x50] sm:$0xff]  ;;  %v113_v10 = vld [vmem:[%s1286_s3 + $0x48] sm:$0xff]  ;;  %v112_v11 = vld [vmem:[%s1286_s3 + $0x40] sm:$0xff] }
   0x5   :  { %802 = vmatmul.msk.f32.vlgmr.msra.gmra.mxu0 %vm62_vm0, %v56_v2  ;;  %v111_v12 = vld [vmem:[%s1286_s3 + $0x38] sm:$0xff]  ;;  %v58_v13 = vld [vmem:[%s1285_s0 + $0x10] sm:$0xff]  ;;  %v109_v15 = vld [vmem:[%s1286_s3 + $0x28] sm:$0xff] }
   0x6   :  { %122 = vmatpush.msra.mxu1 %v117_v5  ;;  %v110_v14 = vld [vmem:[%s1286_s3 + $0x30] sm:$0xff]  ;;  %v108_v16 = vld [vmem:[%s1286_s3 + $0x20] sm:$0xff]  ;;  %v107_v17 = vld [vmem:[%s1286_s3 + $0x18] sm:$0xff] }
   0x7   :  { %v59_v18 = vld [vmem:[%s1285_s0 + $0x18] sm:$0xff]  ;;  %v106_v19 = vld [vmem:[%s1286_s3 + $0x10] sm:$0xff]  ;;  %v105_v20 = vld [vmem:[%s1286_s3 + $0x8] sm:$0xff] }
   0x8   :  { %123 = vmatpush.msra.mxu1 %v116_v6  ;;  %v104_v21 = vld [vmem:[%s1286_s3] sm:$0xff]  ;;  %v45_v50 = vld [vmem:[%s1288_s1 + $0x8] sm:$0xff]  ;;  %v46_v61 = vld [vmem:[%s1288_s1 + $0x10] sm:$0xff] }
   0x9   :  { %v149_v29 = vld [vmem:[%s1287_s4] sm:$0x3]  ;;  %vm49_vm4 = vcmp.gt.f32.partialorder %v45_v50, 0.0  ;;  %vm50_vm7 = vcmp.gt.f32.partialorder %v46_v61, 0.0  ;;  %v47_v4 = vld [vmem:[%s1288_s1 + $0x18] sm:$0xff] }
   0xa   :  { %124 = vmatpush.msra.mxu1 %v115_v7  ;;  %v44_v40 = vld [vmem:[%s1288_s1] sm:$0xff]  ;;  %v1069_v57 = vsel %vm49_vm4, 0.0, %v906_v45  ;;  %v1085_v7 = vsel %vm50_vm7, 0.0, %v906_v45  ;;  %vm51_vm10 = vcmp.gt.f32.partialorder %v47_v4, 0.0 }
   0xb   :  { %vm48_vm1 = vcmp.gt.f32.partialorder %v44_v40, 0.0 }
   0xc   :  { %125 = vmatpush.msra.mxu1 %v114_v9  ;;  %v1059_v46 = vsel %vm48_vm1, 0.0, %v906_v45 }
   0xd   :  { %803 = vmatmul.msk.f32.gmra.mxu0 %vm62_vm0, %v57_v8 }
   0xe   :  { %126 = vmatpush.msra.mxu1 %v113_v10 }
  0x10   :  { %127 = vmatpush.msra.mxu1 %v112_v11 }
  0x12   :  { %128 = vmatpush.msra.mxu1 %v111_v12 }
  0x14   :  { %129 = vmatpush.msra.mxu1 %v110_v14 }
  0x15   :  { %804 = vmatmul.msk.f32.gmra.mxu0 %vm62_vm0, %v58_v13 }
  0x16   :  { %130 = vmatpush.msra.mxu1 %v109_v15  ;;  %v1091_v15 = vsel %vm51_vm10, 0.0, %v906_v45 }
  0x18   :  { %131 = vmatpush.msra.mxu1 %v108_v16 }
  0x1a   :  { %132 = vmatpush.msra.mxu1 %v107_v17 }
  0x1c   :  { %133 = vmatpush.msra.mxu1 %v106_v19 }
  0x1d   :  { %805 = vmatmul.msk.f32.gmra.mxu0 %vm62_vm0, %v59_v18 }
  0x1e   :  { %134 = vmatpush.msra.mxu1 %v105_v20 }
  0x20   :  { %135 = vmatpush.msra.mxu1 %v104_v21 }
  0x82   :  { %v92_v22 = vpop.f32.mrf.mxu0 }
  0x83   :  { %136 = vmatmul.f32.vlgmr.msra.gmra.mxu1 %v92_v22 }
  0x8a   :  { %v95_v23 = vpop.f32.mrf.mxu0 }
  0x8b   :  { %139 = vmatmul.f32.gmra.mxu1 %v95_v23  ;;  %v845_v25 = vpack.i.bf16 %v92_v22, %v95_v23 }
  0x92   :  { %v98_v27 = vpop.f32.mrf.mxu0 }
  0x93   :  { %142 = vmatmul.f32.gmra.mxu1 %v98_v27 }
  0x9a   :  { %v101_v28 = vpop.f32.mrf.mxu0 }
  0x9b   :  { %145 = vmatmul.f32.gmra.mxu1 %v101_v28  ;;  %162 = vmatpush.xpose.msra.mxu2 %v101_v28  ;;  %v840_v34 = vpack.i.bf16 %v98_v27, %v101_v28 }
  0x9c   :  { %276 = vmatpush.msra.mxu3 %v101_v28 }
  0x9e   :  { %277 = vmatpush.msra.mxu3 %v98_v27 }
  0x9f   :  { %163 = vmatpush.xpose.msra.mxu2 %v98_v27 }
  0xa0   :  { %278 = vmatpush.msra.mxu3 %v95_v23 }
  0xa2   :  { %279 = vmatpush.msra.mxu3 %v92_v22 }
  0xa3   :  { %164 = vmatpush.xpose.msra.mxu2 %v95_v23 }
  0xa7   :  { %165 = vmatpush.xpose.msra.mxu2 %v92_v22 }
  0xaa   :  { %166 = vmatmul.f32.vlgmr.msra.gmra.mxu2 %v149_v29 }
 0x100   :  { %v137_v30 = vpop.f32.mrf.mxu1 }
 0x101   :  { %172 = vperm.xlu2 %838, %v137_v30   ;;  %303 = vperm.xlu0 %837, %v137_v30  }
 0x108   :  { %v140_v31 = vpop.f32.mrf.mxu1 }
 0x109   :  { %177 = vperm.xlu2 %838, %v140_v31   ;;  %307 = vperm.xlu0 %837, %v140_v31  }
 0x110   :  { %v143_v32 = vpop.f32.mrf.mxu1 }
 0x111   :  { %182 = vperm.xlu2 %838, %v143_v32   ;;  %311 = vperm.xlu1 %839, %v143_v32  }
 0x112   :  { %851 = vset.pattern.permute.xlu0 %v904_v26 }
 0x118   :  { %v146_v33 = vpop.f32.mrf.mxu1 }
 0x119   :  { %846 = vrot.lane.b32.xlu2 %v845_v25, %s905_s16  ;;  %315 = vperm.xlu1 %839, %v146_v33  }
 0x121   :  { %187 = vperm.xlu2 %838, %v146_v33   ;;  %841 = vrot.lane.b32.xlu1 %v840_v34, %s905_s16 }
 0x122   :  { %850 = vset.pattern.permute.xlu1 %v904_v26 }
 0x12d   :  { %v167_v38 = vpop.f32.mrf.mxu2 }
 0x12e   :  { %v318_v39 = vperm.slane %v167_v38, 1  ;;  %v190_v49 = vperm.slane %v167_v38, 0 }
 0x15b   :  { %v173_v35 = vpop.permute.xlu2 %172 }
 0x15c   :  { %v191_v13 = vadd.f32 %v190_v49, %v173_v35 }
 0x15e   :  { %v199_v19 = vmul.f32 0.2, %v191_v13  ;;  %vm195_vm12 = vcmp.gt.f32.partialorder %v191_v13, 0.0 }
 0x160   :  { %v203_v27 = vsel %vm195_vm12, %v191_v13, %v199_v19 }
 0x161   :  { %v207_v29 = vadd.f32 %v203_v27, %v1059_v46 }
 0x163   :  { %v178_v36 = vpop.permute.xlu2 %177  ;;  %v212_v33 = vsel %vm211_vm3, %v207_v29, -inf }
 0x164   :  { %v192_v53 = vadd.f32 %v190_v49, %v178_v36 }
 0x166   :  { %v200_v56 = vmul.f32 0.2, %v192_v53  ;;  %vm196_vm6 = vcmp.gt.f32.partialorder %v192_v53, 0.0 }
 0x168   :  { %v204_v2 = vsel %vm196_vm6, %v192_v53, %v200_v56 }
 0x169   :  { %v1083_v5 = vadd.f32 %v204_v2, %v1069_v57 }
 0x16b   :  { %v1052_v37 = vpop.permute.xlu2 %182  ;;  %v215_v12 = vsel %vm211_vm3, %v1083_v5, -inf }
 0x16c   :  { %v193_v25 = vadd.f32 %v190_v49, %v1052_v37 }
 0x16e   :  { %v201_v30 = vmul.f32 0.2, %v193_v25  ;;  %vm197_vm13 = vcmp.gt.f32.partialorder %v193_v25, 0.0 }
 0x170   :  { %v205_v34 = vsel %vm197_vm13, %v193_v25, %v201_v30 }
 0x171   :  { %v209_v35 = vadd.f32 %v205_v34, %v1085_v7  ;;  %v491_v34 = vld [vmem:[%s1290_s6 + $0x70] sm:$0xff] }
 0x173   :  { %v304_v41 = vpop.permute.xlu0 %303  ;;  %v1057_v44 = vpop.permute.xlu2 %846  ;;  %v218_v36 = vsel %vm211_vm3, %v209_v35, -inf }
 0x174   :  { %v319_v42 = vadd.f32 %v318_v39, %v304_v41  ;;  %v848_v31 = vunpack.i.l.bf16 %v1057_v44  ;;  %v849_v32 = vunpack.i.h.bf16 %v1057_v44 }
 0x176   :  { %vm323_vm2 = vcmp.gt.f32.partialorder %v319_v42, 0.0  ;;  %v327_v43 = vmul.f32 0.2, %v319_v42 }
 0x178   :  { %v331_v47 = vsel %vm323_vm2, %v319_v42, %v327_v43 }
 0x179   :  { %v1062_v48 = vadd.f32 %v331_v47, %v1059_v46 }
 0x17b   :  { %v308_v51 = vpop.permute.xlu0 %307  ;;  %v339_v52 = vsel %vm211_vm3, %v1062_v48, -inf  ;;  %v188_v59 = vpop.permute.xlu2 %187 }
 0x17c   :  { %v320_v54 = vadd.f32 %v318_v39, %v308_v51  ;;  %340 = vmax.xlane.f32.xlu0 %v339_v52  ;;  %v194_v0 = vadd.f32 %v190_v49, %v188_v59 }
 0x17e   :  { %vm324_vm5 = vcmp.gt.f32.partialorder %v320_v54, 0.0  ;;  %v328_v55 = vmul.f32 0.2, %v320_v54  ;;  %v202_v6 = vmul.f32 0.2, %v194_v0  ;;  %vm198_vm9 = vcmp.gt.f32.partialorder %v194_v0, 0.0 }
 0x180   :  { %v332_v58 = vsel %vm324_vm5, %v320_v54, %v328_v55  ;;  %v206_v16 = vsel %vm198_vm9, %v194_v0, %v202_v6  ;;  %vm796_vm5 = vcmask 11264  }
 0x181   :  { %v1072_v60 = vadd.f32 %v332_v58, %v1069_v57  ;;  %v1094_v18 = vadd.f32 %v206_v16, %v1091_v15 }
 0x183   :  { %v312_v62 = vpop.permute.xlu1 %311  ;;  %v342_v63 = vsel %vm211_vm3, %v1072_v60, -inf  ;;  %v221_v23 = vsel %vm211_vm3, %v1094_v18, -inf }
 0x184   :  { %v321_v1 = vadd.f32 %v318_v39, %v312_v62  ;;  %343 = vmax.xlane.f32.xlu1 %v342_v63 }
 0x186   :  { %vm325_vm8 = vcmp.gt.f32.partialorder %v321_v1, 0.0  ;;  %v329_v3 = vmul.f32 0.2, %v321_v1 }
 0x188   :  { %v333_v8 = vsel %vm325_vm8, %v321_v1, %v329_v3 }
 0x189   :  { %v337_v9 = vadd.f32 %v333_v8, %v1085_v7 }
 0x18b   :  { %v316_v10 = vpop.permute.xlu1 %315  ;;  %v345_v11 = vsel %vm211_vm3, %v337_v9, -inf }
 0x18c   :  { %v322_v14 = vadd.f32 %v318_v39, %v316_v10  ;;  %346 = vmax.xlane.f32.xlu2 %v345_v11  ;;  %216 = vmax.xlane.f32.xlu1 %v215_v12 }
 0x18e   :  { %vm326_vm11 = vcmp.gt.f32.partialorder %v322_v14, 0.0  ;;  %v330_v17 = vmul.f32 0.2, %v322_v14 }
 0x190   :  { %v334_v20 = vsel %vm326_vm11, %v322_v14, %v330_v17 }
 0x191   :  { %v338_v21 = vadd.f32 %v334_v20, %v1091_v15 }
 0x193   :  { %v842_v22 = vpop.permute.xlu1 %841  ;;  %v348_v24 = vsel %vm211_vm3, %v338_v21, -inf }
 0x194   :  { %222 = vmax.xlane.f32.xlu1 %v221_v23  ;;  %349 = vmax.xlane.f32.xlu0 %v348_v24  ;;  %v843_v26 = vunpack.i.l.bf16 %v842_v22  ;;  %v844_v28 = vunpack.i.h.bf16 %v842_v22 }
 0x196   :  { %419 = vmatpush.msrb.mxu2 %v843_v26 }
 0x198   :  { %420 = vmatpush.msrb.mxu2 %v844_v28 }
 0x19a   :  { %421 = vmatpush.msrb.mxu2 %v848_v31 }
 0x19c   :  { %213 = vmax.xlane.f32.xlu0 %v212_v33  ;;  %422 = vmatpush.msrb.mxu2 %v849_v32  ;;  %v492_v33 = vld [vmem:[%s1290_s6 + $0x78] sm:$0xff] }
 0x19d   :  { %493 = vmatpush.msrb.mxu0 %v492_v33 }
 0x19f   :  { %494 = vmatpush.msrb.mxu0 %v491_v34  ;;  %v571_v34 = vld [vmem:[%s1292_s8] sm:$0x1] }
 0x1a4   :  { %219 = vmax.xlane.f32.xlu0 %v218_v36 }
 0x1ef   :  { %v341_v37 = vpop.xlane.xlu0 %340 }
 0x1f0   :  { %v351_v38 = vsub.f32 %v1062_v48, %v341_v37  ;;  %v489_v37 = vld [vmem:[%s1290_s6 + $0x60] sm:$0xff] }
 0x1f2   :  { %v355_v39 = vmul.f32 1.442695, %v351_v38 }
 0x1f4   :  { %855 = vpow2.f32 %v355_v39 }
 0x1f7   :  { %v344_v40 = vpop.xlane.xlu1 %343 }
 0x1f8   :  { %v352_v41 = vsub.f32 %v1072_v60, %v344_v40 }
 0x1fa   :  { %v856_v42 = vpop.eup %855  ;;  %v357_v43 = vmul.f32 1.442695, %v352_v41 }
 0x1fb   :  { %810 = vmatmul.msk.f32.vlgmr.msrb.gmra.mxu2 %vm211_vm3, %v856_v42  ;;  %v363_v44 = vsel %vm211_vm3, %v856_v42, 0.0  ;;  %v488_v42 = vld [vmem:[%s1290_s6 + $0x58] sm:$0xff] }
 0x1fc   :  { %857 = vpow2.f32 %v357_v43  ;;  %364 = vadd.xlane.f32.xlu2 %v363_v44  ;;  %v487_v43 = vld [vmem:[%s1290_s6 + $0x50] sm:$0xff] }
 0x1ff   :  { %v347_v45 = vpop.xlane.xlu2 %346  ;;  %v217_v47 = vpop.xlane.xlu1 %216 }
 0x200   :  { %v353_v49 = vsub.f32 %v337_v9, %v347_v45  ;;  %v225_v50 = vsub.f32 %v1083_v5, %v217_v47  ;;  %v486_v45 = vld [vmem:[%s1290_s6 + $0x48] sm:$0xff]  ;;  %v485_v47 = vld [vmem:[%s1290_s6 + $0x40] sm:$0xff] }
 0x202   :  { %v858_v51 = vpop.eup %857  ;;  %v359_v48 = vmul.f32 1.442695, %v353_v49  ;;  %v230_v52 = vmul.f32 1.442695, %v225_v50 }
 0x203   :  { %811 = vmatmul.msk.f32.gmra.mxu2 %vm211_vm3, %v858_v51  ;;  %v366_v10 = vsel %vm211_vm3, %v858_v51, 0.0 }
 0x204   :  { %859 = vpow2.f32 %v359_v48  ;;  %v484_v48 = vld [vmem:[%s1290_s6 + $0x38] sm:$0xff] }
 0x205   :  { %861 = vpow2.f32 %v230_v52  ;;  %v483_v52 = vld [vmem:[%s1290_s6 + $0x30] sm:$0xff] }
 0x207   :  { %v350_v53 = vpop.xlane.xlu0 %349  ;;  %v223_v8 = vpop.xlane.xlu1 %222 }
 0x208   :  { %v354_v54 = vsub.f32 %v338_v21, %v350_v53  ;;  %v227_v9 = vsub.f32 %v1094_v18, %v223_v8 }
 0x20a   :  { %v860_v55 = vpop.eup %859  ;;  %v361_v56 = vmul.f32 1.442695, %v354_v54  ;;  %v234_v11 = vmul.f32 1.442695, %v227_v9 }
 0x20b   :  { %v862_v58 = vpop.eup %861  ;;  %812 = vmatmul.msk.f32.gmra.mxu2 %vm211_vm3, %v860_v55  ;;  %v369_v1 = vsel %vm211_vm3, %v860_v55, 0.0 }
 0x20c   :  { %863 = vpow2.f32 %v361_v56  ;;  %v239_v59 = vsel %vm211_vm3, %v862_v58, 0.0 }
 0x20d   :  { %240 = vadd.xlane.f32.xlu1 %v239_v59 }
 0x20f   :  { %v214_v60 = vpop.xlane.xlu0 %213 }
 0x210   :  { %v224_v61 = vsub.f32 %v207_v29, %v214_v60 }
 0x212   :  { %v864_v62 = vpop.eup %863  ;;  %v228_v63 = vmul.f32 1.442695, %v224_v61  ;;  %v482_v61 = vld [vmem:[%s1290_s6 + $0x28] sm:$0xff] }
 0x213   :  { %813 = vmatmul.msk.f32.gmra.mxu2 %vm211_vm3, %v864_v62  ;;  %v372_v0 = vsel %vm211_vm3, %v864_v62, 0.0  ;;  %v481_v62 = vld [vmem:[%s1290_s6 + $0x20] sm:$0xff] }
 0x214   :  { %865 = vpow2.f32 %v228_v63  ;;  %373 = vadd.xlane.f32.xlu2 %v372_v0  ;;  %v480_v63 = vld [vmem:[%s1290_s6 + $0x18] sm:$0xff]  ;;  %v479_v0 = vld [vmem:[%s1290_s6 + $0x10] sm:$0xff] }
 0x215   :  { %370 = vadd.xlane.f32.xlu1 %v369_v1  ;;  %v478_v1 = vld [vmem:[%s1290_s6 + $0x8] sm:$0xff] }
 0x217   :  { %v220_v2 = vpop.xlane.xlu0 %219 }
 0x218   :  { %v226_v4 = vsub.f32 %v209_v35, %v220_v2  ;;  %v490_v35 = vld [vmem:[%s1290_s6 + $0x68] sm:$0xff]  ;;  %v477_v2 = vld [vmem:[%s1290_s6] sm:$0xff] }
 0x219   :  { %495 = vmatpush.msrb.mxu0 %v490_v35 }
 0x21a   :  { %v866_v3 = vpop.eup %865  ;;  %v232_v6 = vmul.f32 1.442695, %v226_v4  ;;  %v852_v4 = vld [vmem:[%s1289_s5] ss:$0 sm:$0xff] }
 0x21b   :  { %806 = vmatmul.msk.f32.vlgmr.msra.gmra.mxu3 %vm211_vm3, %v866_v3  ;;  %v236_v5 = vsel %vm211_vm3, %v866_v3, 0.0  ;;  %496 = vmatpush.msrb.mxu0 %v489_v37 }
 0x21c   :  { %237 = vadd.xlane.f32.xlu0 %v236_v5  ;;  %867 = vpow2.f32 %v232_v6 }
 0x21d   :  { %869 = vpow2.f32 %v234_v11  ;;  %497 = vmatpush.msrb.mxu0 %v488_v42  ;;  %v529_v11 = vld [vmem:[%s1291_s7 + $0x38] sm:$0xff] }
 0x21e   :  { %550 = vmatpush.msrb.mxu3 %v529_v11 }
 0x21f   :  { %498 = vmatpush.msrb.mxu0 %v487_v43 }
 0x221   :  { %499 = vmatpush.msrb.mxu0 %v486_v45 }
 0x222   :  { %v868_v12 = vpop.eup %867 }
 0x223   :  { %807 = vmatmul.msk.f32.gmra.mxu3 %vm211_vm3, %v862_v58  ;;  %v242_v13 = vsel %vm211_vm3, %v868_v12, 0.0  ;;  %v870_v14 = vpop.eup %869  ;;  %500 = vmatpush.msrb.mxu0 %v485_v47 }
 0x224   :  { %367 = vadd.xlane.f32.xlu0 %v366_v10  ;;  %v245_v16 = vsel %vm211_vm3, %v870_v14, 0.0 }
 0x225   :  { %501 = vmatpush.msrb.mxu0 %v484_v48 }
 0x227   :  { %502 = vmatpush.msrb.mxu0 %v483_v52 }
 0x229   :  { %503 = vmatpush.msrb.mxu0 %v482_v61 }
 0x22b   :  { %808 = vmatmul.msk.f32.gmra.mxu3 %vm211_vm3, %v868_v12  ;;  %504 = vmatpush.msrb.mxu0 %v481_v62  ;;  %v528_v12 = vld [vmem:[%s1291_s7 + $0x30] sm:$0xff] }
 0x22c   :  { %243 = vadd.xlane.f32.xlu0 %v242_v13  ;;  %v527_v13 = vld [vmem:[%s1291_s7 + $0x28] sm:$0xff]  ;;  %551 = vmatpush.msrb.mxu3 %v528_v12 }
 0x22d   :  { %505 = vmatpush.msrb.mxu0 %v480_v63 }
 0x22e   :  { %552 = vmatpush.msrb.mxu3 %v527_v13 }
 0x22f   :  { %506 = vmatpush.msrb.mxu0 %v479_v0 }
 0x231   :  { %507 = vmatpush.msrb.mxu0 %v478_v1 }
 0x233   :  { %809 = vmatmul.msk.f32.gmra.mxu3 %vm211_vm3, %v870_v14  ;;  %508 = vmatpush.msrb.mxu0 %v477_v2 }
 0x234   :  { %246 = vadd.xlane.f32.xlu0 %v245_v16  ;;  %v526_v16 = vld [vmem:[%s1291_s7 + $0x20] sm:$0xff] }
 0x235   :  { %553 = vmatpush.msrb.mxu3 %v526_v16 }
 0x26f   :  { %v365_v17 = vpop.xlane.xlu2 %364 }
 0x270   :  { %871 = vrcp.f32 %v365_v17  ;;  %v525_v17 = vld [vmem:[%s1291_s7 + $0x18] sm:$0xff] }
 0x271   :  { %554 = vmatpush.msrb.mxu3 %v525_v17 }
 0x276   :  { %v872_v18 = vpop.eup %871 }
 0x27e   :  { %v424_v19 = vpop.f32.mrf.mxu2 }
 0x27f   :  { %v436_v20 = vmul.f32 %v872_v18, %v424_v19  ;;  %v524_v18 = vld [vmem:[%s1291_s7 + $0x10] sm:$0xff]  ;;  %v523_v19 = vld [vmem:[%s1291_s7 + $0x8] sm:$0xff] }
 0x280   :  { %v241_v21 = vpop.xlane.xlu1 %240  ;;  %555 = vmatpush.msrb.mxu3 %v524_v18 }
 0x281   :  { %444 = vrot.lane.b32.xlu2 %v436_v20, %s905_s16 }
 0x282   :  { %556 = vmatpush.msrb.mxu3 %v523_v19 }
 0x286   :  { %v427_v22 = vpop.f32.mrf.mxu2 }
 0x287   :  { %v374_v24 = vpop.xlane.xlu2 %373 }
 0x288   :  { %v371_v23 = vpop.xlane.xlu1 %370 }
 0x289   :  { %873 = vrcp.f32 %v371_v23 }
 0x28a   :  { %875 = vrcp.f32 %v374_v24 }
 0x28e   :  { %v430_v25 = vpop.f32.mrf.mxu2 }
 0x28f   :  { %v874_v26 = vpop.eup %873  ;;  %v238_v27 = vpop.xlane.xlu0 %237 }
 0x290   :  { %v438_v28 = vmul.f32 %v874_v26, %v430_v25  ;;  %v876_v29 = vpop.eup %875  ;;  %877 = vrcp.f32 %v238_v27 }
 0x292   :  { %448 = vrot.lane.b32.xlu0 %v438_v28, %s905_s16 }
 0x296   :  { %v433_v30 = vpop.f32.mrf.mxu2  ;;  %v878_v36 = vpop.eup %877 }
 0x297   :  { %v439_v31 = vmul.f32 %v876_v29, %v433_v30  ;;  %v368_v32 = vpop.xlane.xlu0 %367  ;;  %v522_v29 = vld [vmem:[%s1291_s7] sm:$0xff] }
 0x298   :  { %879 = vrcp.f32 %v368_v32  ;;  %557 = vmatpush.msrb.mxu3 %v522_v29  ;;  %v765_v29 = vld [vmem:[%s1294_s11 + $0x20] sm:$0xff] }
 0x299   :  { %450 = vrot.lane.b32.xlu2 %v439_v31, %s905_s16  ;;  %881 = vrcp.f32 %v241_v21 }
 0x29e   :  { %v880_v38 = vpop.eup %879  ;;  %v281_v39 = vpop.f32.mrf.mxu3 }
 0x29f   :  { %v293_v40 = vmul.f32 %v878_v36, %v281_v39  ;;  %v437_v41 = vmul.f32 %v880_v38, %v427_v22  ;;  %v244_v44 = vpop.xlane.xlu0 %243  ;;  %v882_v49 = vpop.eup %881 }
 0x2a0   :  { %883 = vrcp.f32 %v244_v44 }
 0x2a1   :  { %298 = vst.msk [vmem:[#allocation2] sm:$0xff] %vm297_vm14, %v293_v40  ;;  %446 = vrot.lane.b32.xlu1 %v437_v41, %s905_s16 }
 0x2a6   :  { %v284_v50 = vpop.f32.mrf.mxu3  ;;  %v884_v54 = vpop.eup %883 }
 0x2a7   :  { %v294_v51 = vmul.f32 %v882_v49, %v284_v50  ;;  %v247_v53 = vpop.xlane.xlu0 %246 }
 0x2a8   :  { %885 = vrcp.f32 %v247_v53 }
 0x2a9   :  { %299 = vst.msk [vmem:[#allocation2 + $0x8] sm:$0xff] %vm297_vm14, %v294_v51 }
 0x2ae   :  { %v287_v55 = vpop.f32.mrf.mxu3  ;;  %v886_v58 = vpop.eup %885 }
 0x2af   :  { %v295_v56 = vmul.f32 %v884_v54, %v287_v55 }
 0x2b1   :  { %300 = vst.msk [vmem:[#allocation2 + $0x10] sm:$0xff] %vm297_vm14, %v295_v56 }
 0x2b6   :  { %v290_v59 = vpop.f32.mrf.mxu3 }
 0x2b7   :  { %v296_v60 = vmul.f32 %v886_v58, %v290_v59 }
 0x2b9   :  { %301 = vst.msk [vmem:[#allocation2 + $0x18] sm:$0xff] %vm297_vm14, %v296_v60 }
 0x2db   :  { %v445_v3 = vpop.permute.xlu2 %444 }
 0x2dc   :  { %457 = vst.msk [vmem:[#allocation2] sm:$0xff] %vm456_vm15, %v445_v3 }
 0x2e3   :  { %v461_v5 = vld [vmem:[#allocation2] sm:$0xff] }
 0x2e4   :  { %v469_v6 = vadd.f32 %v852_v4, %v461_v5 }
 0x2e6   :  { %v473_v8 = vmax.f32 %v469_v6, 0.0 }
 0x2e8   :  { %509 = vmatmul.f32.vlgmr.msrb.gmra.mxu0 %v473_v8 }
 0x2f3   :  { %v451_v9 = vpop.permute.xlu2 %450 }
 0x2f4   :  { %460 = vst.msk [vmem:[#allocation2 + $0x18] sm:$0xff] %vm456_vm15, %v451_v9 }
 0x2fb   :  { %v464_v26 = vld [vmem:[#allocation2 + $0x18] sm:$0xff] }
 0x2fc   :  { %v472_v27 = vadd.f32 %v852_v4, %v464_v26  ;;  %v766_v26 = vld [vmem:[%s1294_s11 + $0x28] sm:$0xff] }
 0x2fe   :  { %v476_v28 = vmax.f32 %v472_v27, 0.0 }
 0x304   :  { %v449_v10 = vpop.permute.xlu0 %448 }
 0x305   :  { %459 = vst.msk [vmem:[#allocation2 + $0x10] sm:$0xff] %vm456_vm15, %v449_v10 }
 0x30c   :  { %v463_v23 = vld [vmem:[#allocation2 + $0x10] sm:$0xff] }
 0x30d   :  { %v471_v24 = vadd.f32 %v852_v4, %v463_v23 }
 0x30f   :  { %v475_v25 = vmax.f32 %v471_v24, 0.0  ;;  %v768_v24 = vld [vmem:[%s1294_s11 + $0x38] sm:$0xff] }
 0x310   :  { %784 = vmatpush.msra.mxu0 %v768_v24 }
 0x313   :  { %v447_v14 = vpop.permute.xlu1 %446 }
 0x314   :  { %458 = vst.msk [vmem:[#allocation2 + $0x8] sm:$0xff] %vm456_vm15, %v447_v14 }
 0x31b   :  { %v462_v20 = vld [vmem:[#allocation2 + $0x8] sm:$0xff] }
 0x31c   :  { %v470_v21 = vadd.f32 %v852_v4, %v462_v20 }
 0x31e   :  { %v474_v22 = vmax.f32 %v470_v21, 0.0 }
 0x320   :  { %512 = vmatmul.f32.gmra.mxu0 %v474_v22 }
 0x328   :  { %515 = vmatmul.f32.gmra.mxu0 %v475_v25  ;;  %v767_v25 = vld [vmem:[%s1294_s11 + $0x30] sm:$0xff] }
 0x329   :  { %785 = vmatpush.msra.mxu0 %v767_v25 }
 0x32b   :  { %786 = vmatpush.msra.mxu0 %v766_v26 }
 0x32d   :  { %787 = vmatpush.msra.mxu0 %v765_v29 }
 0x330   :  { %518 = vmatmul.f32.gmra.mxu0 %v476_v28 }
 0x365   :  { %v510_v30 = vpop.f32.mrf.mxu0 }
 0x366   :  { %814 = vmatmul.msk.f32.vlgmr.msrb.gmra.mxu3 %vm297_vm14, %v510_v30 }
 0x39d   :  { %v513_v31 = vpop.f32.mrf.mxu0 }
 0x39e   :  { %815 = vmatmul.msk.f32.gmra.mxu3 %vm297_vm14, %v513_v31 }
 0x3a5   :  { %v516_v32 = vpop.f32.mrf.mxu0 }
 0x3a6   :  { %816 = vmatmul.msk.f32.gmra.mxu3 %vm297_vm14, %v516_v32 }
 0x3ad   :  { %v519_v33 = vpop.f32.mrf.mxu0 }
 0x3ae   :  { %817 = vmatmul.msk.f32.gmra.mxu3 %vm297_vm14, %v519_v33  ;;  %700 = vmatpush.msrb.mxu1 %v519_v33 }
 0x3af   :  { %818 = vmatpush.xpose.msk.msra.mxu3 %vm297_vm14, %v519_v33  ;;  %829 = vmatpush.msra.mxu2 %v519_v33 }
 0x3b0   :  { %701 = vmatpush.msrb.mxu1 %v516_v32 }
 0x3b1   :  { %830 = vmatpush.msra.mxu2 %v516_v32 }
 0x3b2   :  { %702 = vmatpush.msrb.mxu1 %v513_v31 }
 0x3b3   :  { %819 = vmatpush.xpose.msk.msra.mxu3 %vm297_vm14, %v516_v32  ;;  %831 = vmatpush.msra.mxu2 %v513_v31  ;;  %v764_v32 = vld [vmem:[%s1294_s11 + $0x18] sm:$0xff] }
 0x3b4   :  { %703 = vmatpush.msrb.mxu1 %v510_v30  ;;  %788 = vmatpush.msra.mxu0 %v764_v32 }
 0x3b5   :  { %832 = vmatpush.msra.mxu2 %v510_v30 }
 0x3b7   :  { %820 = vmatpush.xpose.msk.msra.mxu3 %vm297_vm14, %v513_v31 }
 0x3bb   :  { %821 = vmatpush.xpose.msk.msra.mxu3 %vm297_vm14, %v510_v30 }
 0x3be   :  { %822 = vmatmul.msk.f32.vlgmr.msra.gmra.mxu3 %vm297_vm14, %v571_v34 }
 0x3e9   :  { %v559_v35 = vpop.f32.mrf.mxu3 }
 0x421   :  { %v562_v36 = vpop.f32.mrf.mxu3 }
 0x422   :  { %602 = vperm.xlu0 %851, %v562_v36   ;;  %v763_v36 = vld [vmem:[%s1294_s11 + $0x10] sm:$0xff] }
 0x423   :  { %789 = vmatpush.msra.mxu0 %v763_v36 }
 0x429   :  { %v565_v37 = vpop.f32.mrf.mxu3 }
 0x42a   :  { %607 = vperm.xlu1 %850, %v565_v37   ;;  %v762_v37 = vld [vmem:[%s1294_s11 + $0x8] sm:$0xff] }
 0x42b   :  { %790 = vmatpush.msra.mxu0 %v762_v37 }
 0x431   :  { %v568_v38 = vpop.f32.mrf.mxu3 }
 0x432   :  { %597 = vperm.xlu1 %850, %v559_v35   ;;  %612 = vperm.xlu2 %838, %v568_v38  }
 0x441   :  { %v592_v39 = vpop.f32.mrf.mxu3 }
 0x442   :  { %v615_v40 = vperm.slane %v592_v39, 0 }
 0x48c   :  { %v613_v41 = vpop.permute.xlu2 %612 }
 0x48d   :  { %v619_v42 = vadd.f32 %v615_v40, %v613_v41 }
 0x48f   :  { %vm623_vm0 = vcmp.gt.f32.partialorder %v619_v42, 0.0  ;;  %v627_v43 = vmul.f32 0.2, %v619_v42 }
 0x491   :  { %v631_v44 = vsel %vm623_vm0, %v619_v42, %v627_v43 }
 0x492   :  { %v635_v45 = vadd.f32 %v631_v44, %v1091_v15 }
 0x494   :  { %v645_v47 = vsel %vm211_vm3, %v635_v45, -inf  ;;  %v603_v49 = vpop.permute.xlu0 %602 }
 0x495   :  { %646 = vmax.xlane.f32.xlu1 %v645_v47  ;;  %v617_v51 = vadd.f32 %v615_v40, %v603_v49 }
 0x497   :  { %v625_v53 = vmul.f32 0.2, %v617_v51  ;;  %vm621_vm2 = vcmp.gt.f32.partialorder %v617_v51, 0.0 }
 0x499   :  { %v629_v15 = vsel %vm621_vm2, %v617_v51, %v625_v53 }
 0x49a   :  { %v633_v61 = vadd.f32 %v629_v15, %v1069_v57 }
 0x49c   :  { %v608_v50 = vpop.permute.xlu1 %607  ;;  %v639_v0 = vsel %vm211_vm3, %v633_v61, -inf }
 0x49d   :  { %v618_v48 = vadd.f32 %v615_v40, %v608_v50 }
 0x49f   :  { %vm622_vm1 = vcmp.gt.f32.partialorder %v618_v48, 0.0  ;;  %v626_v52 = vmul.f32 0.2, %v618_v48 }
 0x4a1   :  { %v630_v54 = vsel %vm622_vm1, %v618_v48, %v626_v52 }
 0x4a2   :  { %v634_v55 = vadd.f32 %v630_v54, %v1085_v7 }
 0x4a4   :  { %v598_v56 = vpop.permute.xlu1 %597  ;;  %v642_v58 = vsel %vm211_vm3, %v634_v55, -inf }
 0x4a5   :  { %v616_v59 = vadd.f32 %v615_v40, %v598_v56  ;;  %643 = vmax.xlane.f32.xlu2 %v642_v58  ;;  %v761_v40 = vld [vmem:[%s1294_s11] sm:$0xff] }
 0x4a6   :  { %791 = vmatpush.msra.mxu0 %v761_v40  ;;  %v854_v58 = vld [vmem:[%s1296_s12] ss:$0 sm:$0xff] }
 0x4a7   :  { %vm620_vm4 = vcmp.gt.f32.partialorder %v616_v59, 0.0  ;;  %v624_v60 = vmul.f32 0.2, %v616_v59 }
 0x4a9   :  { %v628_v62 = vsel %vm620_vm4, %v616_v59, %v624_v60 }
 0x4aa   :  { %v632_v63 = vadd.f32 %v628_v62, %v1059_v46 }
 0x4ac   :  { %v636_v1 = vsel %vm211_vm3, %v632_v63, -inf }
 0x4ad   :  { %640 = vmax.xlane.f32.xlu2 %v639_v0  ;;  %637 = vmax.xlane.f32.xlu0 %v636_v1 }
 0x508   :  { %v647_v7 = vpop.xlane.xlu1 %646 }
 0x509   :  { %v651_v2 = vsub.f32 %v635_v45, %v647_v7  ;;  %v853_v45 = vld [vmem:[%s1293_s9] ss:$0 sm:$0xff] }
 0x50b   :  { %v658_v3 = vmul.f32 1.442695, %v651_v2 }
 0x50d   :  { %887 = vpow2.f32 %v658_v3 }
 0x513   :  { %v888_v4 = vpop.eup %887 }
 0x514   :  { %v669_v5 = vsel %vm211_vm3, %v888_v4, 0.0 }
 0x515   :  { %670 = vadd.xlane.f32.xlu1 %v669_v5 }
 0x518   :  { %v644_v6 = vpop.xlane.xlu2 %643 }
 0x519   :  { %v650_v8 = vsub.f32 %v634_v55, %v644_v6  ;;  %v737_v55 = vld [vmem:[%s1295_s10] sm:$0xf] }
 0x51b   :  { %v656_v57 = vmul.f32 1.442695, %v650_v8 }
 0x51d   :  { %889 = vpow2.f32 %v656_v57 }
 0x520   :  { %v641_v9 = vpop.xlane.xlu2 %640  ;;  %v638_v46 = vpop.xlane.xlu0 %637 }
 0x521   :  { %v649_v10 = vsub.f32 %v633_v61, %v641_v9  ;;  %v648_v11 = vsub.f32 %v632_v63, %v638_v46 }
 0x523   :  { %v890_v12 = vpop.eup %889  ;;  %v654_v13 = vmul.f32 1.442695, %v649_v10  ;;  %v652_v14 = vmul.f32 1.442695, %v648_v11 }
 0x524   :  { %825 = vmatmul.msk.f32.vlgmr.msra.gmra.mxu2 %vm211_vm3, %v890_v12  ;;  %v666_v16 = vsel %vm211_vm3, %v890_v12, 0.0 }
 0x525   :  { %891 = vpow2.f32 %v654_v13  ;;  %667 = vadd.xlane.f32.xlu2 %v666_v16 }
 0x526   :  { %893 = vpow2.f32 %v652_v14 }
 0x52b   :  { %v892_v17 = vpop.eup %891 }
 0x52c   :  { %v894_v18 = vpop.eup %893  ;;  %826 = vmatmul.msk.f32.gmra.mxu2 %vm211_vm3, %v888_v4  ;;  %v663_v19 = vsel %vm211_vm3, %v892_v17, 0.0 }
 0x52d   :  { %823 = vmatmul.msk.f32.vlgmr.msrb.gmra.mxu1 %vm211_vm3, %v894_v18  ;;  %664 = vadd.xlane.f32.xlu1 %v663_v19  ;;  %v660_v20 = vsel %vm211_vm3, %v894_v18, 0.0 }
 0x52e   :  { %661 = vadd.xlane.f32.xlu0 %v660_v20 }
 0x535   :  { %824 = vmatmul.msk.f32.gmra.mxu1 %vm211_vm3, %v892_v17 }
 0x588   :  { %v671_v22 = vpop.xlane.xlu1 %670 }
 0x598   :  { %v668_v21 = vpop.xlane.xlu2 %667 }
 0x599   :  { %895 = vrcp.f32 %v668_v21 }
 0x59f   :  { %v896_v27 = vpop.eup %895 }
 0x5a0   :  { %v665_v31 = vpop.xlane.xlu1 %664 }
 0x5a1   :  { %v662_v23 = vpop.xlane.xlu0 %661 }
 0x5a2   :  { %897 = vrcp.f32 %v662_v23 }
 0x5a3   :  { %899 = vrcp.f32 %v671_v22 }
 0x5a4   :  { %901 = vrcp.f32 %v665_v31 }
 0x5a7   :  { %v711_v28 = vpop.f32.mrf.mxu2 }
 0x5a8   :  { %v719_v30 = vmul.f32 %v896_v27, %v711_v28  ;;  %v898_v33 = vpop.eup %897 }
 0x5a9   :  { %v900_v38 = vpop.eup %899 }
 0x5aa   :  { %723 = vst.msk [vmem:[#allocation3 + $0x10] sm:$0xff] %vm297_vm14, %v719_v30  ;;  %v705_v34 = vpop.f32.mrf.mxu1  ;;  %v902_v42 = vpop.eup %901 }
 0x5ab   :  { %v717_v35 = vmul.f32 %v898_v33, %v705_v34 }
 0x5ad   :  { %721 = vst.msk [vmem:[#allocation3] sm:$0xff] %vm297_vm14, %v717_v35 }
 0x5af   :  { %v714_v39 = vpop.f32.mrf.mxu2 }
 0x5b0   :  { %v720_v41 = vmul.f32 %v900_v38, %v714_v39 }
 0x5b1   :  { %v727_v49 = vld [vmem:[#allocation3 + $0x10] sm:$0xff] }
 0x5b2   :  { %724 = vst.msk [vmem:[#allocation3 + $0x18] sm:$0xff] %vm297_vm14, %v720_v41  ;;  %v708_v43 = vpop.f32.mrf.mxu1  ;;  %v735_v51 = vadd.f32 %v853_v45, %v727_v49 }
 0x5b3   :  { %v718_v44 = vmul.f32 %v902_v42, %v708_v43 }
 0x5b4   :  { %v725_v52 = vld [vmem:[#allocation3] sm:$0xff] }
 0x5b5   :  { %722 = vst.msk [vmem:[#allocation3 + $0x8] sm:$0xff] %vm297_vm14, %v718_v44  ;;  %v733_v54 = vadd.f32 %v853_v45, %v725_v52 }
 0x5b9   :  { %v728_v47 = vld [vmem:[#allocation3 + $0x18] sm:$0xff] }
 0x5ba   :  { %v736_v50 = vadd.f32 %v853_v45, %v728_v47 }
 0x5bc   :  { %753 = vmatpush.msrb.mxu2 %v736_v50  ;;  %v726_v48 = vld [vmem:[#allocation3 + $0x8] sm:$0xff] }
 0x5bd   :  { %v734_v53 = vadd.f32 %v853_v45, %v726_v48 }
 0x5be   :  { %754 = vmatpush.msrb.mxu2 %v735_v51 }
 0x5c0   :  { %755 = vmatpush.msrb.mxu2 %v734_v53 }
 0x5c2   :  { %756 = vmatpush.msrb.mxu2 %v733_v54 }
 0x5c3   :  { %827 = vmatmul.msk.f32.vlgmr.msrb.gmra.mxu2 %vm211_vm3, %v737_v55 }
 0x646   :  { %v758_v56 = vpop.f32.mrf.mxu2 }
 0x647   :  { %828 = vmatmul.msk.f32.vlgmr.msra.gmra.mxu0 %vm297_vm14, %v758_v56 }
 0x6c4   :  { %v793_v59 = vpop.f32.mrf.mxu0 }
 0x6c5   :  { %v794_v15 = vadd.f32 %v854_v58, %v793_v59 }
 0x6c7   :  { %797 = vst.msk [vmem:[%s1297_s13] sm:$0xf] %vm796_vm5, %v794_v15 }

</bundles_post_ra>
